<compile_context>
chip_gen: v7x
topology: tpu7x:2x2x1
jax: 0.10.0
libtpu: 0.0.40
codegen_flags: <defaults>
</compile_context>

<pallas_src>
import math

import jax
import jax.numpy as jnp
from jax.experimental import pallas as pl
from jax.experimental.pallas import tpu as pltpu


def _round_up(x, m):
    return ((x + m - 1) // m) * m


def unit_gcn_kernel(xp_ref, w_cat_ref, g_sum_ref, g_exp_ref, bn_ref, out_ref):
    """Single-invocation kernel (no grid).

    xp_ref    : (NTp, CVp)    f32  x in lane-dense, lane-aligned (n,t | c,v) layout
    w_cat_ref : (CVp, 2*OVp)  f32  [ fused main weights | down-path weights ]
    g_sum_ref : (2*OVp, 2*O)  f32  per-channel group-average matrix (1/(N*T*V) entries)
    g_exp_ref : (2*O, 2*OVp)  f32  per-channel -> per-lane expand matrix
    bn_ref    : (2, 2*OVp)    f32  rows: gamma lanes, beta lanes (main | down)
    out_ref   : (NTp, OVp)    f32  relu(BN(main) + BN(down)), lane-dense
    """
    xp = xp_ref[...]

    # One MXU matmul produces BOTH branches: lanes [0, OVp) are the summed
    # K-subset graph-conv branch, lanes [OVp, 2*OVp) are the down/residual path.
    yc = jnp.dot(xp, w_cat_ref[...], preferred_element_type=jnp.float32)

    # Training-mode BatchNorm with batch statistics for both branches at once,
    # single pass (sum & sum-of-squares).  Channels are groups of V consecutive
    # lanes; the group reduce / broadcast is done with two tiny matmuls.
    s1 = jnp.sum(yc, axis=0, keepdims=True)          # (1, 2*OVp)
    s2 = jnp.sum(yc * yc, axis=0, keepdims=True)     # (1, 2*OVp)
    g_sum = g_sum_ref[...]
    g_exp = g_exp_ref[...]
    mean = jnp.dot(jnp.dot(s1, g_sum, preferred_element_type=jnp.float32),
                   g_exp, preferred_element_type=jnp.float32)        # (1, 2*OVp)
    ex2 = jnp.dot(jnp.dot(s2, g_sum, preferred_element_type=jnp.float32),
                  g_exp, preferred_element_type=jnp.float32)         # (1, 2*OVp)
    var = jnp.maximum(ex2 - mean * mean, 0.0)        # biased variance
    inv = jax.lax.rsqrt(var + 1e-5)
    ybn = (yc - mean) * (inv * bn_ref[0:1, :]) + bn_ref[1:2, :]

    # Split at the lane-aligned OVp boundary, add the two branches, ReLU.
    ovp = out_ref.shape[1]
    out_ref[...] = jnp.maximum(ybn[:, :ovp] + ybn[:, ovp:], 0.0)


def unit_gcn_forward(x, A, W, b, Wd, bd, gamma, beta, gamma_d, beta_d):
    # Conv biases (b, bd) are constant per output channel and are exactly
    # cancelled by the training-mode BN mean subtraction -> not sent to kernel.
    del b, bd
    N, C, T, V = x.shape
    K, O, _ = W.shape
    NT, CV, OV = N * T, C * V, O * V
    NTp = _round_up(NT, 8)          # sublane alignment
    CVp = _round_up(CV, 128)        # lane alignment (contraction dim)
    OVp = _round_up(OV, 128)        # lane alignment (output dim)
    hp = jax.lax.Precision.HIGHEST

    # ---------------- wrapper-side precompute (tiny) ----------------
    # torch.norm(PA, 2, dim=1, keepdim=True): per-subset column L2 norm.
    An = A / (jnp.sqrt(jnp.sum(A * A, axis=1, keepdims=True)) + 1e-4)   # (K,V,V)

    # Fuse (1x1 conv_k) o (graph matmul A_k), summed over k, into one
    # (C*V, O*V) weight:  B[(c,w),(o,v)] = sum_k W[k,o,c] * An[k,w,v].
    w_main = jnp.einsum('koc,kwv->cwov', W, An, precision=hp).reshape(CV, OV)
    # Down-path 1x1 conv in the same (C*V)->(O*V) layout (identity over vertices).
    w_down = jnp.einsum('oc,wv->cwov', Wd, jnp.eye(V, dtype=jnp.float32),
                        precision=hp).reshape(CV, OV)

    def pad2(w):
        return jnp.pad(w, ((0, CVp - CV), (0, OVp - OV)))

    # Concatenate both branches along the output-lane dim -> one MXU matmul.
    w_cat = jnp.concatenate([pad2(w_main), pad2(w_down)], axis=1)       # (CVp, 2*OVp)

    # BN per-channel group reduce / expand matrices for the concatenated,
    # zero-padded lane layout.  Pad lanes map to no channel; divisor uses the
    # TRUE per-channel element count NT*V.
    lanes = jnp.arange(2 * OVp)
    branch = lanes // OVp
    j = lanes % OVp
    valid = (j < OV).astype(jnp.float32)
    chan = branch * O + jnp.minimum(j // V, O - 1)
    g = (chan[:, None] == jnp.arange(2 * O)[None, :]).astype(jnp.float32)
    g = g * valid[:, None]                                              # (2*OVp, 2*O)
    g_sum = g / float(NT * V)
    g_exp = g.T                                                         # (2*O, 2*OVp)

    # Pack BN scale/shift vectors, expanded to per-lane (pad lanes -> 0).
    def lanevec(v):
        return jnp.pad(jnp.repeat(v.astype(jnp.float32), V), (0, OVp - OV))
    bn_pack = jnp.stack(
        [jnp.concatenate([lanevec(gamma), lanevec(gamma_d)]),
         jnp.concatenate([lanevec(beta), lanevec(beta_d)])], axis=0)    # (2, 2*OVp)

    # Lane-dense input layout: (N, C, T, V) -> (N, T, C, V) -> (N*T, C*V), padded.
    xp = jnp.transpose(x, (0, 2, 1, 3)).reshape(NT, CV)
    xp = jnp.pad(xp, ((0, NTp - NT), (0, CVp - CV)))

    # Size the scoped-VMEM limit to the actual footprint with generous headroom;
    # everything here is fully VMEM-resident.
    vmem_need = 4 * int(xp.size + w_cat.size + g_sum.size + g_exp.size
                        + bn_pack.size + NTp * OVp + NTp * 2 * OVp)
    vmem_limit = int(min(64 * 1024 * 1024, max(8 * vmem_need, 4 * 1024 * 1024)))

    out2 = pl.pallas_call(
        unit_gcn_kernel,
        out_shape=jax.ShapeDtypeStruct((NTp, OVp), jnp.float32),
        in_specs=[pl.BlockSpec(memory_space=pltpu.MemorySpace.VMEM)] * 5,
        out_specs=pl.BlockSpec(memory_space=pltpu.MemorySpace.VMEM),
        compiler_params=pltpu.CompilerParams(vmem_limit_bytes=vmem_limit),
    )(xp, w_cat, g_sum, g_exp, bn_pack)

    # Strip padding, back to the PyTorch NCHW-style (N, O, T, V) layout.
    out2 = out2[:NT, :OV]
    return out2.reshape(N, T, O, V).transpose(0, 2, 1, 3)


def unit_gcn_reference(x, A, W, b, Wd, bd, gamma, beta, gamma_d, beta_d):
    """Pure-JAX reference of the same forward pass (straight port of PyTorch)."""
    N, C, T, V = x.shape
    K, O, _ = W.shape
    hp = jax.lax.Precision.HIGHEST
    An = A / (jnp.linalg.norm(A, ord=2, axis=1, keepdims=True) + 1e-4)
    y = jnp.zeros((N, O, T, V), jnp.float32)
    for i in range(K):
        xa = jnp.einsum('nctv,vw->nctw', x, An[i], precision=hp)
        z = jnp.einsum('oc,nctw->notw', W[i], xa, precision=hp) \
            + b[i][None, :, None, None]
        y = y + z

    def bn(v, g, bta):
        mean = v.mean(axis=(0, 2, 3), keepdims=True)
        var = ((v - mean) ** 2).mean(axis=(0, 2, 3), keepdims=True)
        return (v - mean) / jnp.sqrt(var + 1e-5) * g[None, :, None, None] \
            + bta[None, :, None, None]

    y = bn(y, gamma, beta)
    xd = jnp.einsum('oc,nctv->notv', Wd, x, precision=hp) \
        + bd[None, :, None, None]
    xd = bn(xd, gamma_d, beta_d)
    return jnp.maximum(y + xd, 0.0)


if __name__ == "__main__":
    # Small shapes consistent with the module: skeleton graph with V=25 joints.
    N, C_in, C_out, T, V, K = 2, 4, 8, 16, 25, 3

    key = jax.random.PRNGKey(0)
    k_x, k_a, k_w, k_wd = jax.random.split(key, 4)

    x = jax.random.normal(k_x, (N, C_in, T, V), jnp.float32)

    # Adaptive adjacency parameter PA: (num_subset, V, V)
    A = jax.random.normal(k_a, (K, V, V), jnp.float32)

    # conv_d[i] weights: Conv2d(C_in, C_out, 1) with conv_branch_init std
    std_branch = math.sqrt(2.0 / (C_out * C_in * 1 * K))
    W = jax.random.normal(k_w, (K, C_out, C_in), jnp.float32) * std_branch
    b = jnp.zeros((K, C_out), jnp.float32)                 # conv_branch_init: bias = 0

    # Down path conv: kaiming_normal fan_out -> std = sqrt(2 / C_out), bias = 0
    Wd = jax.random.normal(k_wd, (C_out, C_in), jnp.float32) * math.sqrt(2.0 / C_out)
    bd = jnp.zeros((C_out,), jnp.float32)

    # BatchNorm params: main bn scale 1e-6 (bn_init(self.bn, 1e-6)), down bn scale 1.
    gamma = jnp.full((C_out,), 1e-6, jnp.float32)
    beta = jnp.zeros((C_out,), jnp.float32)
    gamma_d = jnp.ones((C_out,), jnp.float32)
    beta_d = jnp.zeros((C_out,), jnp.float32)

    out = jax.block_until_ready(
        unit_gcn_forward(x, A, W, b, Wd, bd, gamma, beta, gamma_d, beta_d))
    ref = jax.block_until_ready(
        unit_gcn_reference(x, A, W, b, Wd, bd, gamma, beta, gamma_d, beta_d))

    assert out.shape == (N, C_out, T, V)
    # Tolerance accounts for default MXU f32 matmul precision and the different
    # (but mathematically identical) fused factorization vs. the reference.
    assert jnp.allclose(out, ref, rtol=2e-2, atol=2e-2), \
        f"max abs diff = {jnp.max(jnp.abs(out - ref))}"

    print("KERNEL_OK")
</pallas_src>

<mosaic_0001>
module attributes {stable_mosaic.version = 11 : i64} {
  func.func @unit_gcn_kernel(%arg0: memref<32x128xf32, #tpu.memory_space<vmem>>, %arg1: memref<128x512xf32, #tpu.memory_space<vmem>>, %arg2: memref<512x16xf32, #tpu.memory_space<vmem>>, %arg3: memref<16x512xf32, #tpu.memory_space<vmem>>, %arg4: memref<2x512xf32, #tpu.memory_space<vmem>>, %arg5: memref<32x256xf32, #tpu.memory_space<vmem>>) attributes {dimension_semantics = [], scalar_prefetch = 0 : i64, scratch_operands = 0 : i64, tpu.core_type = #tpu.core_type<tc>} {
    %c0 = arith.constant 0 : index
    %c0_0 = arith.constant 0 : index
    %0 = vector.load %arg0[%c0, %c0_0] : memref<32x128xf32, #tpu.memory_space<vmem>>, vector<32x128xf32>
    %c0_1 = arith.constant 0 : index
    %c0_2 = arith.constant 0 : index
    %1 = vector.load %arg1[%c0_1, %c0_2] : memref<128x512xf32, #tpu.memory_space<vmem>>, vector<128x512xf32>
    %cst = arith.constant dense<0.000000e+00> : vector<32x512xf32>
    %2 = tpu.matmul %0, %1, %cst {dimension_numbers = #tpu.dot_dimension_numbers<[1], [0], [0], [1], [0, 0, 1, 1], [], []>} : vector<32x128xf32>, vector<128x512xf32>, vector<32x512xf32> -> vector<32x512xf32>
    %cst_3 = arith.constant dense<0.000000e+00> : vector<512xf32>
    %3 = vector.multi_reduction <add>, %2, %cst_3 [0] : vector<32x512xf32> to vector<512xf32>
    %4 = vector.shape_cast %3 : vector<512xf32> to vector<1x512xf32>
    %5 = arith.mulf %2, %2 : vector<32x512xf32>
    %cst_4 = arith.constant dense<0.000000e+00> : vector<512xf32>
    %6 = vector.multi_reduction <add>, %5, %cst_4 [0] : vector<32x512xf32> to vector<512xf32>
    %7 = vector.shape_cast %6 : vector<512xf32> to vector<1x512xf32>
    %c0_5 = arith.constant 0 : index
    %c0_6 = arith.constant 0 : index
    %8 = vector.load %arg2[%c0_5, %c0_6] : memref<512x16xf32, #tpu.memory_space<vmem>>, vector<512x16xf32>
    %c0_7 = arith.constant 0 : index
    %c0_8 = arith.constant 0 : index
    %9 = vector.load %arg3[%c0_7, %c0_8] : memref<16x512xf32, #tpu.memory_space<vmem>>, vector<16x512xf32>
    %cst_9 = arith.constant dense<0.000000e+00> : vector<1x16xf32>
    %10 = tpu.matmul %4, %8, %cst_9 {dimension_numbers = #tpu.dot_dimension_numbers<[1], [0], [0], [1], [0, 0, 1, 1], [], []>} : vector<1x512xf32>, vector<512x16xf32>, vector<1x16xf32> -> vector<1x16xf32>
    %cst_10 = arith.constant dense<0.000000e+00> : vector<1x512xf32>
    %11 = tpu.matmul %10, %9, %cst_10 {dimension_numbers = #tpu.dot_dimension_numbers<[1], [0], [0], [1], [0, 0, 1, 1], [], []>} : vector<1x16xf32>, vector<16x512xf32>, vector<1x512xf32> -> vector<1x512xf32>
    %cst_11 = arith.constant dense<0.000000e+00> : vector<1x16xf32>
    %12 = tpu.matmul %7, %8, %cst_11 {dimension_numbers = #tpu.dot_dimension_numbers<[1], [0], [0], [1], [0, 0, 1, 1], [], []>} : vector<1x512xf32>, vector<512x16xf32>, vector<1x16xf32> -> vector<1x16xf32>
    %cst_12 = arith.constant dense<0.000000e+00> : vector<1x512xf32>
    %13 = tpu.matmul %12, %9, %cst_12 {dimension_numbers = #tpu.dot_dimension_numbers<[1], [0], [0], [1], [0, 0, 1, 1], [], []>} : vector<1x16xf32>, vector<16x512xf32>, vector<1x512xf32> -> vector<1x512xf32>
    %14 = arith.mulf %11, %11 : vector<1x512xf32>
    %15 = arith.subf %13, %14 : vector<1x512xf32>
    %cst_13 = arith.constant 0.000000e+00 : f32
    %16 = vector.broadcast %cst_13 : f32 to vector<1x512xf32>
    %17 = arith.maximumf %15, %16 : vector<1x512xf32>
    %cst_14 = arith.constant 9.99999974E-6 : f32
    %18 = vector.broadcast %cst_14 : f32 to vector<1x512xf32>
    %19 = arith.addf %17, %18 : vector<1x512xf32>
    %20 = math.rsqrt %19 : vector<1x512xf32>
    %21 = vector.broadcast %11 : vector<1x512xf32> to vector<32x512xf32>
    %22 = arith.subf %2, %21 : vector<32x512xf32>
    %c0_15 = arith.constant 0 : index
    %c0_16 = arith.constant 0 : index
    %23 = vector.load %arg4[%c0_15, %c0_16] : memref<2x512xf32, #tpu.memory_space<vmem>>, vector<1x512xf32>
    %24 = arith.mulf %20, %23 : vector<1x512xf32>
    %25 = vector.broadcast %24 : vector<1x512xf32> to vector<32x512xf32>
    %26 = arith.mulf %22, %25 : vector<32x512xf32>
    %c1 = arith.constant 1 : index
    %c0_17 = arith.constant 0 : index
    %27 = vector.load %arg4[%c1, %c0_17] : memref<2x512xf32, #tpu.memory_space<vmem>>, vector<1x512xf32>
    %28 = vector.broadcast %27 : vector<1x512xf32> to vector<32x512xf32>
    %29 = arith.addf %26, %28 : vector<32x512xf32>
    %30 = vector.extract_strided_slice %29 {offsets = [0, 0], sizes = [32, 256], strides = [1, 1]} : vector<32x512xf32> to vector<32x256xf32>
    %31 = vector.extract_strided_slice %29 {offsets = [0, 256], sizes = [32, 256], strides = [1, 1]} : vector<32x512xf32> to vector<32x256xf32>
    %32 = arith.addf %30, %31 : vector<32x256xf32>
    %cst_18 = arith.constant 0.000000e+00 : f32
    %33 = vector.broadcast %cst_18 : f32 to vector<32x256xf32>
    %34 = arith.maximumf %32, %33 : vector<32x256xf32>
    %c0_19 = arith.constant 0 : index
    %c0_20 = arith.constant 0 : index
    %35 = vector.load %arg5[%c0_19, %c0_20] : memref<32x256xf32, #tpu.memory_space<vmem>>, vector<32x256xf32>
    tpu.vector_store %arg5[%c0_19, %c0_20], %34 {strides = array<i32>} : memref<32x256xf32, #tpu.memory_space<vmem>>, vector<32x256xf32>,
    return
  }
}

</mosaic_0001>

<bundles_post_ra>
// kernel: tpu_custom_call.1
= control target key start
LH: loop header
LB: loop body
LE: loop exit
PB: predicated region body
PF: predicated region fallthrough
CT: control target
= control target key end

     0   :  { %10 = vsyncpa [#allocation3], 0  ;;  %s2447_s0 = inlined_call_operand.hbm [shape: f32[32,128], index: 0, kind: input, shape index: {}]   ;;  %s2448_s1 = inlined_call_operand.vmem [shape: f32[128,512], index: 1, kind: input, shape index: {}]   ;;  %s2449_s2 = inlined_call_operand.vmem [shape: f32[512,16], index: 2, kind: input, shape index: {}]   ;;  %s2450_s3 = inlined_call_operand.vmem [shape: f32[16,512], index: 3, kind: input, shape index: {}]   ;;  %s2451_s4 = inlined_call_operand.vmem [shape: f32[2,512], index: 4, kind: input, shape index: {}]   ;;  %s2452_s5 = inlined_call_operand.hbm [shape: f32[32,256], index: 5, kind: output, shape index: {}]  }
   0x1   :  { %11 = vsyncpa [#allocation4], 0  ;;  %s1618_s18 = smov [#allocation2]   ;;  %s1570_s22 = scalar_lea.hbm %s2447_s0, 512 }
   0x2   :  { %s17_s19 = sshll.u32 %s1618_s18, 4  ;;  %p1571_p0 = scmp.ne.s32.totalorder %s2447_s0, %s1570_s22  ;;  %s18_s19 = int_to_ptr.vmem [resolvable:$true] %s17_s19 }
   0x3   :  { %p1574_p1 = scmp.lt.u32.totalorder %s1570_s22, %s2447_s0 }
   0x5   :  { %p1576_p2 = pnand %p1574_p1, %p1571_p0 }
   0x7   :  { %1579 = shalt.err (!%p1576_p2)
}
   0x8   :  { %s1580_s27 = scalar_lea.vmem %s18_s19, 512  ;;  %p1585_p4 = scmp.lt.s32.totalorder %s18_s19, %s18_s19 }
   0x9   :  { %p1581_p3 = scmp.ne.s32.totalorder %s18_s19, %s1580_s27  ;;  %p1586_p5 = scmp.lt.s32.totalorder %s1580_s27, %s1580_s27 }
   0xb   :  { %p1587_p6 = por %p1586_p5, %p1585_p4 }
   0xd   :  { %p1588_p7 = pnand %p1587_p6, %p1581_p3 }
   0xf   :  { %1591 = shalt.err (!%p1588_p7)
}
  0x10   :  { %s1619_s28 = smov 128   ;;  %s1620_s29 = smov 8  }
  0x11   :  { %23 = dma.hbm_to_vmem [thread:$0]  %s2447_s0, 512, %s18_s19, [#allocation3], %s1619_s28, %s1619_s28, %s1620_s29  }
  0x12   :  { %1614 = dma.done.wait [#allocation3], 512  }
  0x13   :  { %1615 = vsyncadd [#allocation3], 4294966784  ;;  %v2453_v0 = vmov 0.0   ;;  %v40_v1 = vld [vmem:[%s2448_s1 + $0x8] sm:$0xff]  ;;  %v42_v3 = vld [vmem:[%s2448_s1 + $0x18] sm:$0xff]  ;;  %vm581_vm0 = vcmask 130048  }
  0x14   :  { %167 = vmatprep.mubr.f32.mxu0 %v2453_v0  ;;  %256 = vmatprep.mubr.f32.mxu1 %v2453_v0  ;;  %v44_v2 = vld [vmem:[%s2448_s1 + $0x28] sm:$0xff]  ;;  %v46_v5 = vld [vmem:[%s2448_s1 + $0x38] sm:$0xff]  ;;  %v39_v6 = vld [vmem:[%s2448_s1] sm:$0xff] }
  0x15   :  { %v1347_v4 = vpack.c.bf16 %v44_v2, %v40_v1  ;;  %v43_v7 = vld [vmem:[%s2448_s1 + $0x20] sm:$0xff]  ;;  %v1379_v8 = vpack.c.bf16 %v46_v5, %v42_v3  ;;  %v41_v10 = vld [vmem:[%s2448_s1 + $0x10] sm:$0xff]  ;;  %v48_v12 = vld [vmem:[%s2448_s1 + $0x48] sm:$0xff] }
  0x16   :  { %v1349_v9 = vpack.c.bf16 %v43_v7, %v39_v6  ;;  %v45_v11 = vld [vmem:[%s2448_s1 + $0x30] sm:$0xff]  ;;  %v52_v14 = vld [vmem:[%s2448_s1 + $0x68] sm:$0xff]  ;;  %v50_v15 = vld [vmem:[%s2448_s1 + $0x58] sm:$0xff] }
  0x17   :  { %1348 = vmatprep.subr.bf16.mxu0 %v1347_v4  ;;  %v1381_v13 = vpack.c.bf16 %v45_v11, %v41_v10  ;;  %v54_v16 = vld [vmem:[%s2448_s1 + $0x78] sm:$0xff]  ;;  %1380 = vmatprep.subr.bf16.mxu1 %v1379_v8  ;;  %v1351_v17 = vpack.c.bf16 %v52_v14, %v48_v12  ;;  %v47_v19 = vld [vmem:[%s2448_s1 + $0x40] sm:$0xff]  ;;  %v49_v21 = vld [vmem:[%s2448_s1 + $0x50] sm:$0xff] }
  0x18   :  { %1350 = vmatpush1.bf16.msra.mxu0 %v1349_v9  ;;  %v1383_v18 = vpack.c.bf16 %v54_v16, %v50_v15  ;;  %v51_v20 = vld [vmem:[%s2448_s1 + $0x60] sm:$0xff]  ;;  %v53_v23 = vld [vmem:[%s2448_s1 + $0x70] sm:$0xff]  ;;  %v56_v24 = vld [vmem:[%s2448_s1 + $0x88] sm:$0xff] }
  0x19   :  { %1382 = vmatpush1.bf16.msra.mxu1 %v1381_v13  ;;  %v1353_v22 = vpack.c.bf16 %v51_v20, %v47_v19  ;;  %v60_v25 = vld [vmem:[%s2448_s1 + $0xa8] sm:$0xff]  ;;  %1352 = vmatprep.subr.bf16.mxu0 %v1351_v17  ;;  %v1385_v26 = vpack.c.bf16 %v53_v23, %v49_v21  ;;  %v58_v28 = vld [vmem:[%s2448_s1 + $0x98] sm:$0xff]  ;;  %v55_v30 = vld [vmem:[%s2448_s1 + $0x80] sm:$0xff] }
  0x1a   :  { %1384 = vmatprep.subr.bf16.mxu1 %v1383_v18  ;;  %v1355_v27 = vpack.c.bf16 %v60_v25, %v56_v24  ;;  %v62_v29 = vld [vmem:[%s2448_s1 + $0xb8] sm:$0xff]  ;;  %v59_v32 = vld [vmem:[%s2448_s1 + $0xa0] sm:$0xff]  ;;  %v57_v33 = vld [vmem:[%s2448_s1 + $0x90] sm:$0xff] }
  0x1b   :  { %v1387_v31 = vpack.c.bf16 %v62_v29, %v58_v28  ;;  %v61_v34 = vld [vmem:[%s2448_s1 + $0xb0] sm:$0xff]  ;;  %v1357_v35 = vpack.c.bf16 %v59_v32, %v55_v30  ;;  %v64_v36 = vld [vmem:[%s2448_s1 + $0xc8] sm:$0xff]  ;;  %v66_v38 = vld [vmem:[%s2448_s1 + $0xd8] sm:$0xff] }
  0x1c   :  { %1354 = vmatpush1.bf16.msra.mxu0 %v1353_v22  ;;  %v68_v37 = vld [vmem:[%s2448_s1 + $0xe8] sm:$0xff]  ;;  %v1389_v39 = vpack.c.bf16 %v61_v34, %v57_v33  ;;  %v70_v41 = vld [vmem:[%s2448_s1 + $0xf8] sm:$0xff]  ;;  %v63_v42 = vld [vmem:[%s2448_s1 + $0xc0] sm:$0xff] }
  0x1d   :  { %1386 = vmatpush1.bf16.msra.mxu1 %v1385_v26  ;;  %1356 = vmatprep.subr.bf16.mxu0 %v1355_v27  ;;  %v1359_v40 = vpack.c.bf16 %v68_v37, %v64_v36  ;;  %v67_v43 = vld [vmem:[%s2448_s1 + $0xe0] sm:$0xff]  ;;  %v1391_v44 = vpack.c.bf16 %v70_v41, %v66_v38  ;;  %v65_v45 = vld [vmem:[%s2448_s1 + $0xd0] sm:$0xff]  ;;  %v72_v47 = vld [vmem:[%s2448_s1 + $0x108] sm:$0xff] }
  0x1e   :  { %1388 = vmatprep.subr.bf16.mxu1 %v1387_v31  ;;  %v69_v46 = vld [vmem:[%s2448_s1 + $0xf0] sm:$0xff]  ;;  %v76_v48 = vld [vmem:[%s2448_s1 + $0x128] sm:$0xff]  ;;  %v74_v49 = vld [vmem:[%s2448_s1 + $0x118] sm:$0xff]  ;;  %v1361_v51 = vpack.c.bf16 %v67_v43, %v63_v42 }
  0x1f   :  { %v78_v50 = vld [vmem:[%s2448_s1 + $0x138] sm:$0xff]  ;;  %v1393_v52 = vpack.c.bf16 %v69_v46, %v65_v45  ;;  %v1363_v53 = vpack.c.bf16 %v76_v48, %v72_v47  ;;  %v71_v54 = vld [vmem:[%s2448_s1 + $0x100] sm:$0xff]  ;;  %v73_v56 = vld [vmem:[%s2448_s1 + $0x110] sm:$0xff] }
  0x20   :  { %1358 = vmatpush1.bf16.msra.mxu0 %v1357_v35  ;;  %v75_v55 = vld [vmem:[%s2448_s1 + $0x120] sm:$0xff]  ;;  %v1395_v57 = vpack.c.bf16 %v78_v50, %v74_v49  ;;  %v77_v58 = vld [vmem:[%s2448_s1 + $0x130] sm:$0xff]  ;;  %v80_v59 = vld [vmem:[%s2448_s1 + $0x148] sm:$0xff] }
  0x21   :  { %1390 = vmatpush1.bf16.msra.mxu1 %v1389_v39  ;;  %1360 = vmatprep.subr.bf16.mxu0 %v1359_v40  ;;  %v84_v60 = vld [vmem:[%s2448_s1 + $0x168] sm:$0xff]  ;;  %v82_v61 = vld [vmem:[%s2448_s1 + $0x158] sm:$0xff]  ;;  %v1365_v63 = vpack.c.bf16 %v75_v55, %v71_v54  ;;  %v1397_v1 = vpack.c.bf16 %v77_v58, %v73_v56  ;;  %v79_v3 = vld [vmem:[%s2448_s1 + $0x140] sm:$0xff] }
  0x22   :  { %1392 = vmatprep.subr.bf16.mxu1 %v1391_v44  ;;  %v86_v62 = vld [vmem:[%s2448_s1 + $0x178] sm:$0xff]  ;;  %v1367_v2 = vpack.c.bf16 %v84_v60, %v80_v59  ;;  %v83_v4 = vld [vmem:[%s2448_s1 + $0x160] sm:$0xff]  ;;  %v81_v5 = vld [vmem:[%s2448_s1 + $0x150] sm:$0xff] }
  0x23   :  { %v1399_v6 = vpack.c.bf16 %v86_v62, %v82_v61  ;;  %v85_v7 = vld [vmem:[%s2448_s1 + $0x170] sm:$0xff]  ;;  %v88_v8 = vld [vmem:[%s2448_s1 + $0x188] sm:$0xff]  ;;  %v90_v10 = vld [vmem:[%s2448_s1 + $0x198] sm:$0xff]  ;;  %v1369_v12 = vpack.c.bf16 %v83_v4, %v79_v3 }
  0x24   :  { %1362 = vmatpush1.bf16.msra.mxu0 %v1361_v51  ;;  %v92_v9 = vld [vmem:[%s2448_s1 + $0x1a8] sm:$0xff]  ;;  %v94_v11 = vld [vmem:[%s2448_s1 + $0x1b8] sm:$0xff]  ;;  %v1401_v13 = vpack.c.bf16 %v85_v7, %v81_v5  ;;  %v87_v15 = vld [vmem:[%s2448_s1 + $0x180] sm:$0xff] }
  0x25   :  { %1394 = vmatpush1.bf16.msra.mxu1 %v1393_v52  ;;  %1364 = vmatprep.subr.bf16.mxu0 %v1363_v53  ;;  %v1371_v14 = vpack.c.bf16 %v92_v9, %v88_v8  ;;  %v91_v16 = vld [vmem:[%s2448_s1 + $0x1a0] sm:$0xff]  ;;  %v89_v17 = vld [vmem:[%s2448_s1 + $0x190] sm:$0xff]  ;;  %v1403_v18 = vpack.c.bf16 %v94_v11, %v90_v10  ;;  %v96_v20 = vld [vmem:[%s2448_s1 + $0x1c8] sm:$0xff] }
  0x26   :  { %1396 = vmatprep.subr.bf16.mxu1 %v1395_v57  ;;  %v93_v19 = vld [vmem:[%s2448_s1 + $0x1b0] sm:$0xff]  ;;  %v100_v21 = vld [vmem:[%s2448_s1 + $0x1e8] sm:$0xff]  ;;  %v98_v22 = vld [vmem:[%s2448_s1 + $0x1d8] sm:$0xff]  ;;  %v1373_v24 = vpack.c.bf16 %v91_v16, %v87_v15 }
  0x27   :  { %v102_v23 = vld [vmem:[%s2448_s1 + $0x1f8] sm:$0xff]  ;;  %v1405_v25 = vpack.c.bf16 %v93_v19, %v89_v17  ;;  %v1375_v26 = vpack.c.bf16 %v100_v21, %v96_v20  ;;  %v95_v27 = vld [vmem:[%s2448_s1 + $0x1c0] sm:$0xff]  ;;  %v97_v29 = vld [vmem:[%s2448_s1 + $0x1d0] sm:$0xff] }
  0x28   :  { %1366 = vmatpush1.bf16.msra.mxu0 %v1365_v63  ;;  %v99_v28 = vld [vmem:[%s2448_s1 + $0x1e0] sm:$0xff]  ;;  %v1407_v30 = vpack.c.bf16 %v102_v23, %v98_v22  ;;  %v101_v31 = vld [vmem:[%s2448_s1 + $0x1f0] sm:$0xff]  ;;  %v386_v33 = vld [vmem:[%s2449_s2 + $0x88] sm:$0xff] }
  0x29   :  { %1398 = vmatpush1.bf16.msra.mxu1 %v1397_v1  ;;  %1368 = vmatprep.subr.bf16.mxu0 %v1367_v2  ;;  %v385_v32 = vld [vmem:[%s2449_s2 + $0x80] sm:$0xff]  ;;  %v418_v35 = vld [vmem:[%s2449_s2 + $0x188] sm:$0xff]  ;;  %v1377_v36 = vpack.c.bf16 %v99_v28, %v95_v27  ;;  %v1409_v37 = vpack.c.bf16 %v101_v31, %v97_v29  ;;  %v37_v48 = vld [vmem:[#allocation2 + $0x10] sm:$0xff] }
  0x2a   :  { %1400 = vmatprep.subr.bf16.mxu1 %v1399_v6  ;;  %v417_v34 = vld [vmem:[%s2449_s2 + $0x180] sm:$0xff]  ;;  %v1873_v38 = vpack.c.bf16 %v386_v33, %v385_v32  ;;  %v370_v41 = vld [vmem:[%s2449_s2 + $0x8] sm:$0xff]  ;;  %v38_v49 = vld [vmem:[#allocation2 + $0x18] sm:$0xff] }
  0x2b   :  { %v1875_v39 = vpack.c.bf16 %v418_v35, %v417_v34  ;;  %v369_v40 = vld [vmem:[%s2449_s2] sm:$0xff]  ;;  %v402_v43 = vld [vmem:[%s2449_s2 + $0x108] sm:$0xff]  ;;  %v387_v50 = vld [vmem:[%s2449_s2 + $0x90] sm:$0xff] }
  0x2c   :  { %1370 = vmatpush1.bf16.msra.mxu0 %v1369_v12  ;;  %v401_v42 = vld [vmem:[%s2449_s2 + $0x100] sm:$0xff]  ;;  %v1890_v45 = vpack.c.bf16 %v370_v41, %v369_v40  ;;  %v36_v47 = vld [vmem:[#allocation2 + $0x8] sm:$0xff]  ;;  %v388_v51 = vld [vmem:[%s2449_s2 + $0x98] sm:$0xff] }
  0x2d   :  { %1402 = vmatpush1.bf16.msra.mxu1 %v1401_v13  ;;  %1372 = vmatprep.subr.bf16.mxu0 %v1371_v14  ;;  %v35_v44 = vld [vmem:[#allocation2] sm:$0xff]  ;;  %v1893_v46 = vpack.c.bf16 %v402_v43, %v401_v42  ;;  %v419_v52 = vld [vmem:[%s2449_s2 + $0x190] sm:$0xff]  ;;  %v1912_v53 = vpack.c.bf16 %v388_v51, %v387_v50  ;;  %v420_v54 = vld [vmem:[%s2449_s2 + $0x198] sm:$0xff] }
  0x2e   :  { %1404 = vmatprep.subr.bf16.mxu1 %v1403_v18  ;;  %v371_v55 = vld [vmem:[%s2449_s2 + $0x10] sm:$0xff]  ;;  %v372_v56 = vld [vmem:[%s2449_s2 + $0x18] sm:$0xff]  ;;  %v1923_v57 = vpack.c.bf16 %v420_v54, %v419_v52  ;;  %v389_v62 = vld [vmem:[%s2449_s2 + $0xa0] sm:$0xff] }
  0x2f   :  { %v1925_v58 = vpack.c.bf16 %v372_v56, %v371_v55  ;;  %v403_v59 = vld [vmem:[%s2449_s2 + $0x110] sm:$0xff]  ;;  %v404_v60 = vld [vmem:[%s2449_s2 + $0x118] sm:$0xff]  ;;  %v390_v63 = vld [vmem:[%s2449_s2 + $0xa8] sm:$0xff] }
  0x30   :  { %1374 = vmatpush1.bf16.msra.mxu0 %v1373_v24  ;;  %v1934_v61 = vpack.c.bf16 %v404_v60, %v403_v59  ;;  %v421_v1 = vld [vmem:[%s2449_s2 + $0x1a0] sm:$0xff]  ;;  %v1948_v2 = vpack.c.bf16 %v390_v63, %v389_v62  ;;  %v422_v3 = vld [vmem:[%s2449_s2 + $0x1a8] sm:$0xff]  ;;  %v391_v11 = vld [vmem:[%s2449_s2 + $0xb0] sm:$0xff] }
  0x31   :  { %1406 = vmatpush1.bf16.msra.mxu1 %v1405_v25  ;;  %1376 = vmatprep.subr.bf16.mxu0 %v1375_v26  ;;  %v373_v4 = vld [vmem:[%s2449_s2 + $0x20] sm:$0xff]  ;;  %v374_v5 = vld [vmem:[%s2449_s2 + $0x28] sm:$0xff]  ;;  %v1959_v6 = vpack.c.bf16 %v422_v3, %v421_v1  ;;  %v392_v12 = vld [vmem:[%s2449_s2 + $0xb8] sm:$0xff] }
  0x32   :  { %1408 = vmatprep.subr.bf16.mxu1 %v1407_v30  ;;  %v1961_v7 = vpack.c.bf16 %v374_v5, %v373_v4  ;;  %v405_v8 = vld [vmem:[%s2449_s2 + $0x120] sm:$0xff]  ;;  %v406_v9 = vld [vmem:[%s2449_s2 + $0x128] sm:$0xff]  ;;  %v423_v13 = vld [vmem:[%s2449_s2 + $0x1b0] sm:$0xff]  ;;  %v1984_v14 = vpack.c.bf16 %v392_v12, %v391_v11 }
  0x33   :  { %v1970_v10 = vpack.c.bf16 %v406_v9, %v405_v8  ;;  %v424_v15 = vld [vmem:[%s2449_s2 + $0x1b8] sm:$0xff]  ;;  %v375_v16 = vld [vmem:[%s2449_s2 + $0x30] sm:$0xff]  ;;  %v393_v23 = vld [vmem:[%s2449_s2 + $0xc0] sm:$0xff] }
  0x34   :  { %1378 = vmatpush1.bf16.msra.mxu0 %v1377_v36  ;;  %v376_v17 = vld [vmem:[%s2449_s2 + $0x38] sm:$0xff]  ;;  %v1995_v18 = vpack.c.bf16 %v424_v15, %v423_v13  ;;  %v407_v20 = vld [vmem:[%s2449_s2 + $0x130] sm:$0xff]  ;;  %v394_v24 = vld [vmem:[%s2449_s2 + $0xc8] sm:$0xff] }
  0x35   :  { %1410 = vmatpush1.bf16.msra.mxu1 %v1409_v37  ;;  %1412 = vmatprep.subr.bf16.mxu0 %v1873_v38  ;;  %v1997_v19 = vpack.c.bf16 %v376_v17, %v375_v16  ;;  %v408_v21 = vld [vmem:[%s2449_s2 + $0x138] sm:$0xff]  ;;  %v425_v25 = vld [vmem:[%s2449_s2 + $0x1c0] sm:$0xff]  ;;  %v2020_v26 = vpack.c.bf16 %v394_v24, %v393_v23  ;;  %v426_v27 = vld [vmem:[%s2449_s2 + $0x1c8] sm:$0xff] }
  0x36   :  { %1444 = vmatprep.subr.bf16.mxu1 %v1875_v39  ;;  %v2006_v22 = vpack.c.bf16 %v408_v21, %v407_v20  ;;  %v377_v28 = vld [vmem:[%s2449_s2 + $0x40] sm:$0xff]  ;;  %v378_v29 = vld [vmem:[%s2449_s2 + $0x48] sm:$0xff]  ;;  %v2031_v30 = vpack.c.bf16 %v426_v27, %v425_v25  ;;  %v395_v35 = vld [vmem:[%s2449_s2 + $0xd0] sm:$0xff] }
  0x37   :  { %168 = vmatmul.mubr.f32.vlgmr.msra.gmra.mrb[0].mxu0 %v35_v44  ;;  %v2033_v31 = vpack.c.bf16 %v378_v29, %v377_v28  ;;  %v409_v32 = vld [vmem:[%s2449_s2 + $0x140] sm:$0xff]  ;;  %v410_v33 = vld [vmem:[%s2449_s2 + $0x148] sm:$0xff]  ;;  %v396_v36 = vld [vmem:[%s2449_s2 + $0xd8] sm:$0xff] }
  0x38   :  { %257 = vmatmul.mubr.f32.vlgmr.msra.gmra.mrb[0].mxu1 %v35_v44  ;;  %173 = vmatprep.mubr.f32.mxu0 %v2453_v0  ;;  %v2042_v34 = vpack.c.bf16 %v410_v33, %v409_v32  ;;  %v427_v37 = vld [vmem:[%s2449_s2 + $0x1d0] sm:$0xff]  ;;  %v2056_v40 = vpack.c.bf16 %v396_v36, %v395_v35  ;;  %v428_v41 = vld [vmem:[%s2449_s2 + $0x1d8] sm:$0xff]  ;;  %v397_v51 = vld [vmem:[%s2449_s2 + $0xe0] sm:$0xff] }
  0x39   :  { %262 = vmatprep.mubr.f32.mxu1 %v2453_v0  ;;  %1414 = vmatpush3.bf16.msra.mxu0 %v1890_v45  ;;  %v379_v42 = vld [vmem:[%s2449_s2 + $0x50] sm:$0xff]  ;;  %v380_v43 = vld [vmem:[%s2449_s2 + $0x58] sm:$0xff]  ;;  %v2067_v44 = vpack.c.bf16 %v428_v41, %v427_v37  ;;  %v398_v52 = vld [vmem:[%s2449_s2 + $0xe8] sm:$0xff] }
  0x3a   :  { %1446 = vmatpush3.bf16.msra.mxu1 %v1893_v46  ;;  %1416 = vmatprep.subr.bf16.mxu0 %v1912_v53  ;;  %v429_v54 = vld [vmem:[%s2449_s2 + $0x1e0] sm:$0xff]  ;;  %v2092_v55 = vpack.c.bf16 %v398_v52, %v397_v51  ;;  %v430_v56 = vld [vmem:[%s2449_s2 + $0x1e8] sm:$0xff]  ;;  %v399_v5 = vld [vmem:[%s2449_s2 + $0xf0] sm:$0xff] }
  0x3b   :  { %174 = vmatmul.mubr.f32.gmra.mrb[2].mxu0 %v36_v47  ;;  %1448 = vmatprep.subr.bf16.mxu1 %v1923_v57  ;;  %v381_v59 = vld [vmem:[%s2449_s2 + $0x60] sm:$0xff]  ;;  %v382_v60 = vld [vmem:[%s2449_s2 + $0x68] sm:$0xff]  ;;  %v2103_v62 = vpack.c.bf16 %v430_v56, %v429_v54  ;;  %v400_v8 = vld [vmem:[%s2449_s2 + $0xf8] sm:$0xff] }
  0x3c   :  { %263 = vmatmul.mubr.f32.gmra.mrb[2].mxu1 %v36_v47  ;;  %179 = vmatprep.mubr.f32.mxu0 %v2453_v0  ;;  %v2069_v47 = vpack.c.bf16 %v380_v43, %v379_v42  ;;  %v2105_v63 = vpack.c.bf16 %v382_v60, %v381_v59  ;;  %v413_v1 = vld [vmem:[%s2449_s2 + $0x160] sm:$0xff]  ;;  %v414_v3 = vld [vmem:[%s2449_s2 + $0x168] sm:$0xff]  ;;  %v431_v9 = vld [vmem:[%s2449_s2 + $0x1f0] sm:$0xff]  ;;  %v2128_v11 = vpack.c.bf16 %v400_v8, %v399_v5 }
  0x3d   :  { %268 = vmatprep.mubr.f32.mxu1 %v2453_v0  ;;  %1418 = vmatpush3.bf16.msra.mxu0 %v1925_v58  ;;  %v2114_v4 = vpack.c.bf16 %v414_v3, %v413_v1  ;;  %v432_v12 = vld [vmem:[%s2449_s2 + $0x1f8] sm:$0xff]  ;;  %v383_v13 = vld [vmem:[%s2449_s2 + $0x70] sm:$0xff] }
  0x3e   :  { %1450 = vmatpush3.bf16.msra.mxu1 %v1934_v61  ;;  %1420 = vmatprep.subr.bf16.mxu0 %v1948_v2  ;;  %v384_v15 = vld [vmem:[%s2449_s2 + $0x78] sm:$0xff]  ;;  %v2139_v16 = vpack.c.bf16 %v432_v12, %v431_v9  ;;  %v415_v20 = vld [vmem:[%s2449_s2 + $0x170] sm:$0xff] }
  0x3f   :  { %180 = vmatmul.mubr.f32.gmra.mrb[4].mxu0 %v37_v48  ;;  %1452 = vmatprep.subr.bf16.mxu1 %v1959_v6  ;;  %v2141_v17 = vpack.c.bf16 %v384_v15, %v383_v13  ;;  %v416_v21 = vld [vmem:[%s2449_s2 + $0x178] sm:$0xff] }
  0x40   :  { %269 = vmatmul.mubr.f32.gmra.mrb[4].mxu1 %v37_v48  ;;  %185 = vmatprep.mubr.f32.mxu0 %v2453_v0  ;;  %v411_v48 = vld [vmem:[%s2449_s2 + $0x150] sm:$0xff]  ;;  %v2150_v23 = vpack.c.bf16 %v416_v21, %v415_v20 }
  0x41   :  { %274 = vmatprep.mubr.f32.mxu1 %v2453_v0  ;;  %1422 = vmatpush3.bf16.msra.mxu0 %v1961_v7 }
  0x42   :  { %1454 = vmatpush3.bf16.msra.mxu1 %v1970_v10  ;;  %1424 = vmatprep.subr.bf16.mxu0 %v1984_v14  ;;  %2488 = vst [vmem:[#allocation8_spill] sm:$0xff] %v2150_v23 }
  0x43   :  { %186 = vmatmul.mubr.f32.gmra.mrb[6].mxu0 %v38_v49  ;;  %1456 = vmatprep.subr.bf16.mxu1 %v1995_v18 }
  0x44   :  { %275 = vmatmul.mubr.f32.gmra.mrb[6].mxu1 %v38_v49  ;;  %v412_v49 = vld [vmem:[%s2449_s2 + $0x158] sm:$0xff] }
  0x45   :  { %1426 = vmatpush3.bf16.msra.mxu0 %v1997_v19  ;;  %v2078_v50 = vpack.c.bf16 %v412_v49, %v411_v48 }
  0x46   :  { %1458 = vmatpush3.bf16.msra.mxu1 %v2006_v22  ;;  %1428 = vmatprep.subr.bf16.mxu0 %v2020_v26 }
  0x47   :  { %1460 = vmatprep.subr.bf16.mxu1 %v2031_v30 }
  0x49   :  { %1430 = vmatpush3.bf16.msra.mxu0 %v2033_v31 }
  0x4a   :  { %1462 = vmatpush3.bf16.msra.mxu1 %v2042_v34  ;;  %1432 = vmatprep.subr.bf16.mxu0 %v2056_v40 }
  0x4b   :  { %1464 = vmatprep.subr.bf16.mxu1 %v2067_v44 }
  0x4d   :  { %1434 = vmatpush3.bf16.msra.mxu0 %v2069_v47 }
  0x4e   :  { %1466 = vmatpush3.bf16.msra.mxu1 %v2078_v50  ;;  %1436 = vmatprep.subr.bf16.mxu0 %v2092_v55 }
  0x4f   :  { %1468 = vmatprep.subr.bf16.mxu1 %v2103_v62 }
  0x51   :  { %1438 = vmatpush3.bf16.msra.mxu0 %v2105_v63 }
  0x52   :  { %1470 = vmatpush3.bf16.msra.mxu1 %v2114_v4  ;;  %1440 = vmatprep.subr.bf16.mxu0 %v2128_v11 }
  0x53   :  { %1472 = vmatprep.subr.bf16.mxu1 %v2139_v16 }
  0x55   :  { %1442 = vmatpush3.bf16.msra.mxu0 %v2141_v17 }
  0x56   :  { %1474 = vmatpush3.bf16.msra.mxu1 %v2150_v23 }
 0x10a   :  { %v2155_v24 = vpop.f32.mrb[0].mxu0 }
 0x10b   :  { %2489 = vst [vmem:[#allocation9_spill] sm:$0xff] %v2155_v24  ;;  %v2157_v25 = vpop.f32.mrb[0].mxu1  ;;  %v2159_v27 = vpop.f32.mrb[1].mxu0  ;;  %v317_v29 = vmul.f32 %v2155_v24, %v2155_v24 }
 0x10c   :  { %2490 = vst [vmem:[#allocation10_spill] sm:$0xff] %v2157_v25  ;;  %2491 = vst [vmem:[#allocation11_spill] sm:$0xff] %v2159_v27  ;;  %v2161_v28 = vpop.f32.mrb[1].mxu1  ;;  %v319_v33 = vmul.f32 %v2157_v25, %v2157_v25  ;;  %v318_v35 = vmul.f32 %v2159_v27, %v2159_v27 }
 0x10d   :  { %2492 = vst [vmem:[#allocation12_spill] sm:$0xff] %v2161_v28  ;;  %v320_v54 = vmul.f32 %v2161_v28, %v2161_v28 }
 0x10e   :  { %v2165_v32 = vpop.f32.mrb[2].mxu0 }
 0x10f   :  { %2493 = vst [vmem:[#allocation13_spill] sm:$0xff] %v2165_v32  ;;  %v281_v36 = vadd.f32 %v2165_v32, %v2155_v24  ;;  %v321_v37 = vmul.f32 %v2165_v32, %v2165_v32  ;;  %v2175_v41 = vpop.f32.mrb[2].mxu1  ;;  %v2177_v42 = vpop.f32.mrb[3].mxu0 }
 0x110   :  { %2494 = vst [vmem:[#allocation14_spill] sm:$0xff] %v2175_v41  ;;  %2495 = vst [vmem:[#allocation15_spill] sm:$0xff] %v2177_v42  ;;  %v299_v43 = vadd.f32 %v2175_v41, %v2157_v25  ;;  %v323_v48 = vmul.f32 %v2175_v41, %v2175_v41  ;;  %v290_v49 = vadd.f32 %v2177_v42, %v2159_v27  ;;  %v2187_v52 = vpop.f32.mrb[3].mxu1 }
 0x111   :  { %v322_v51 = vmul.f32 %v2177_v42, %v2177_v42  ;;  %2496 = vst [vmem:[#allocation16_spill] sm:$0xff] %v2187_v52  ;;  %v333_v56 = vadd.f32 %v321_v37, %v317_v29  ;;  %v308_v59 = vadd.f32 %v2187_v52, %v2161_v28  ;;  %v324_v60 = vmul.f32 %v2187_v52, %v2187_v52 }
 0x112   :  { %v351_v1 = vadd.f32 %v323_v48, %v319_v33  ;;  %v2195_v5 = vpop.f32.mrb[4].mxu0 }
 0x113   :  { %v342_v3 = vadd.f32 %v322_v51, %v318_v35  ;;  %2497 = vst [vmem:[#allocation17_spill] sm:$0xff] %v2195_v5  ;;  %v360_v8 = vadd.f32 %v324_v60, %v320_v54  ;;  %v282_v9 = vadd.f32 %v281_v36, %v2195_v5  ;;  %v325_v12 = vmul.f32 %v2195_v5, %v2195_v5  ;;  %v2200_v13 = vpop.f32.mrb[4].mxu1  ;;  %v2202_v15 = vpop.f32.mrb[5].mxu0 }
 0x114   :  { %2498 = vst [vmem:[#allocation18_spill] sm:$0xff] %v2200_v13  ;;  %2499 = vst [vmem:[#allocation19_spill] sm:$0xff] %v2202_v15  ;;  %v300_v20 = vadd.f32 %v299_v43, %v2200_v13  ;;  %v327_v21 = vmul.f32 %v2200_v13, %v2200_v13  ;;  %v291_v29 = vadd.f32 %v290_v49, %v2202_v15  ;;  %v2210_v35 = vpop.f32.mrb[5].mxu1 }
 0x115   :  { %v326_v33 = vmul.f32 %v2202_v15, %v2202_v15  ;;  %2500 = vst [vmem:[#allocation20_spill] sm:$0xff] %v2210_v35  ;;  %v334_v36 = vadd.f32 %v333_v56, %v325_v12  ;;  %v309_v37 = vadd.f32 %v308_v59, %v2210_v35  ;;  %v328_v48 = vmul.f32 %v2210_v35, %v2210_v35 }
 0x116   :  { %v352_v51 = vadd.f32 %v351_v1, %v327_v21  ;;  %v2215_v60 = vpop.f32.mrb[6].mxu0 }
 0x117   :  { %v343_v54 = vadd.f32 %v342_v3, %v326_v33  ;;  %2501 = vst [vmem:[#allocation21_spill] sm:$0xff] %v2215_v60  ;;  %v361_v43 = vadd.f32 %v360_v8, %v328_v48  ;;  %v283_v0 = vadd.f32 %v282_v9, %v2215_v60  ;;  %v329_v49 = vmul.f32 %v2215_v60, %v2215_v60  ;;  %v2220_v52 = vpop.f32.mrb[6].mxu1  ;;  %v2222_v28 = vpop.f32.mrb[7].mxu0 }
 0x118   :  { %2502 = vst [vmem:[#allocation22_spill] sm:$0xff] %v2220_v52  ;;  %2503 = vst [vmem:[#allocation23_spill] sm:$0xff] %v2222_v28  ;;  %v301_v56 = vadd.f32 %v300_v20, %v2220_v52  ;;  %v331_v59 = vmul.f32 %v2220_v52, %v2220_v52  ;;  %v292_v1 = vadd.f32 %v291_v29, %v2222_v28  ;;  %v2230_v8 = vpop.f32.mrb[7].mxu1 }
 0x119   :  { %v330_v3 = vmul.f32 %v2222_v28, %v2222_v28  ;;  %2504 = vst [vmem:[#allocation24_spill] sm:$0xff] %v2230_v8  ;;  %v284_v9 = vrot.slane %v283_v0, 4  ;;  %v2232_v12 = vadd.f32 %v334_v36, %v329_v49  ;;  %v310_v21 = vadd.f32 %v309_v37, %v2230_v8 }
 0x11a   :  { %v332_v33 = vmul.f32 %v2230_v8, %v2230_v8  ;;  %v302_v48 = vrot.slane %v301_v56, 4  ;;  %v2237_v20 = vadd.f32 %v352_v51, %v331_v59  ;;  %v293_v35 = vrot.slane %v292_v1, 4 }
 0x11b   :  { %v344_v15 = vadd.f32 %v343_v54, %v330_v3  ;;  %v285_v42 = vadd.f32 %v284_v9, %v283_v0  ;;  %v311_v29 = vrot.slane %v310_v21, 4 }
 0x11c   :  { %v362_v27 = vadd.f32 %v361_v43, %v332_v33  ;;  %v303_v52 = vadd.f32 %v302_v48, %v301_v56  ;;  %v294_v28 = vadd.f32 %v293_v35, %v292_v1  ;;  %v2505_v35 = vmov 0.0  }
 0x11d   :  { %v286_v13 = vrot.slane %v285_v42, 2  ;;  %v312_v41 = vadd.f32 %v311_v29, %v310_v21  ;;  %v345_v56 = vrot.slane %v344_v15, 4 }
 0x11e   :  { %v304_v25 = vrot.slane %v303_v52, 2  ;;  %v295_v36 = vrot.slane %v294_v28, 2  ;;  %v363_v1 = vrot.slane %v362_v27, 4 }
 0x11f   :  { %v287_v49 = vadd.f32 %v286_v13, %v285_v42  ;;  %v313_v60 = vrot.slane %v312_v41, 2  ;;  %v437_v42 = vld [vmem:[%s2450_s3 + $0x20] sm:$0xff]  ;;  %v435_v13 = vld [vmem:[%s2450_s3 + $0x10] sm:$0xff] }
 0x120   :  { %v305_v37 = vadd.f32 %v304_v25, %v303_v52  ;;  %v296_v5 = vadd.f32 %v295_v36, %v294_v28  ;;  %v434_v25 = vld [vmem:[%s2450_s3 + $0x8] sm:$0xff]  ;;  %v364_v9 = vadd.f32 %v363_v1, %v362_v27  ;;  %v2518_v1 = vld [vmem:[#allocation23_spill] sm:$0xff] }
 0x121   :  { %v288_v32 = vrot.slane %v287_v49, 1  ;;  %v314_v8 = vadd.f32 %v313_v60, %v312_v41  ;;  %v438_v28 = vld [vmem:[%s2450_s3 + $0x28] sm:$0xff]  ;;  %v433_v41 = vld [vmem:[%s2450_s3] sm:$0xff]  ;;  %v439_v60 = vld [vmem:[%s2450_s3 + $0x30] sm:$0xff] }
 0x122   :  { %v306_v24 = vrot.slane %v305_v37, 1  ;;  %v297_v51 = vrot.slane %v296_v5, 1  ;;  %v2272_v43 = vpack.c.bf16 %v439_v60, %v435_v13  ;;  %v365_v33 = vrot.slane %v364_v9, 2  ;;  %v2516_v13 = vld [vmem:[#allocation15_spill] sm:$0xff] }
 0x123   :  { %v315_v59 = vrot.slane %v314_v8, 1  ;;  %v289_v54 = vadd.f32 %v288_v32, %v287_v49  ;;  %v440_v32 = vld [vmem:[%s2450_s3 + $0x38] sm:$0xff] }
 0x124   :  { %v298_v23 = vadd.f32 %v297_v51, %v296_v5  ;;  %v307_v3 = vadd.f32 %v306_v24, %v305_v37  ;;  %v436_v24 = vld [vmem:[%s2450_s3 + $0x18] sm:$0xff]  ;;  %v2263_v5 = vpack.c.bf16 %v437_v42, %v433_v41  ;;  %v366_v29 = vadd.f32 %v365_v33, %v364_v9  ;;  %v2514_v41 = vld [vmem:[#allocation22_spill] sm:$0xff]  ;;  %v2519_v9 = vld [vmem:[#allocation12_spill] sm:$0xff] }
 0x125   :  { %v316_v0 = vadd.f32 %v315_v59, %v314_v8  ;;  %v2261_v52 = vpack.c.bf16 %v440_v32, %v436_v24  ;;  %v346_v8 = vadd.f32 %v345_v56, %v344_v15  ;;  %v2520_v33 = vld [vmem:[#allocation16_spill] sm:$0xff] }
 0x126   :  { %505 = vmatprep.mubr.f32.mxu0 %v298_v23  ;;  %v2250_v23 = vpack.c.bf16 %v438_v28, %v434_v25  ;;  %v2512_v28 = vld [vmem:[#allocation14_spill] sm:$0xff] }
 0x127   :  { %575 = vmatprep.mubr.f32.mxu1 %v316_v0  ;;  %506 = vmatmul.mubr.f32.vlgmr.msra.gmra.mrb[8].mxu0 %v289_v54  ;;  %v347_v21 = vrot.slane %v346_v8, 2 }
 0x128   :  { %576 = vmatmul.mubr.f32.vlgmr.msra.gmra.mrb[8].mxu1 %v307_v3  ;;  %649 = vmatprep.mubr.f32.mxu0 %v2505_v35  ;;  %v367_v3 = vrot.slane %v366_v29, 1 }
 0x129   :  { %720 = vmatprep.mubr.f32.mxu1 %v2505_v35  ;;  %1476 = vmatprep.subr.bf16.mxu0 %v2250_v23  ;;  %v348_v48 = vadd.f32 %v347_v21, %v346_v8 }
 0x12a   :  { %1480 = vmatprep.subr.bf16.mxu1 %v2261_v52  ;;  %1478 = vmatpush1.bf16.msra.mxu0 %v2263_v5  ;;  %v368_v27 = vadd.f32 %v367_v3, %v366_v29  ;;  %v2521_v29 = vld [vmem:[#allocation20_spill] sm:$0xff] }
 0x12b   :  { %1482 = vmatpush1.bf16.msra.mxu1 %v2272_v43  ;;  %1484 = vmatprep.subr.bf16.mxu0 %v1873_v38  ;;  %v349_v0 = vrot.slane %v348_v48, 1 }
 0x12c   :  { %1516 = vmatprep.subr.bf16.mxu1 %v1875_v39 }
 0x12d   :  { %v350_v39 = vadd.f32 %v349_v0, %v348_v48 }
 0x1fa   :  { %v1239_v36 = vpop.f32.mrb[8].mxu0 }
 0x1fb   :  { %v1274_v49 = vpop.f32.mrb[8].mxu1  ;;  %v1240_v37 = vpop.f32.mrb[9].mxu0 }
 0x1fc   :  { %v1241_v51 = vadd.f32 %v1240_v37, %v1239_v36  ;;  %v1275_v59 = vpop.f32.mrb[9].mxu1 }
 0x1fd   :  { %v1276_v54 = vadd.f32 %v1275_v59, %v1274_v49  ;;  %v2522_v49 = vld [vmem:[#allocation24_spill] sm:$0xff] }
 0x1ff   :  { %v578_v38 = vadd.f32 %v1276_v54, %v1241_v51 }
 0x201   :  { %1202 = vmatmul.mubr.msk.f32.vlgmr.msra.gmra.mrb[10].mxu0 %vm581_vm0, %v578_v38  ;;  %1203 = vmatmul.mubr.msk.f32.vlgmr.msra.gmra.mrb[10].mxu1 %vm581_vm0, %v578_v38 }
 0x202   :  { %1486 = vmatpush3.bf16.msra.mxu0 %v1890_v45  ;;  %1518 = vmatpush3.bf16.msra.mxu1 %v1893_v46  ;;  %v336_v45 = vrot.slane %v2232_v12, 4  ;;  %v354_v46 = vrot.slane %v2237_v20, 4 }
 0x203   :  { %791 = vmatprep.mubr.f32.mxu0 %v350_v39  ;;  %861 = vmatprep.mubr.f32.mxu1 %v368_v27 }
 0x204   :  { %1488 = vmatprep.subr.bf16.mxu0 %v1912_v53  ;;  %1520 = vmatprep.subr.bf16.mxu1 %v1923_v57  ;;  %v337_v53 = vadd.f32 %v336_v45, %v2232_v12  ;;  %v355_v57 = vadd.f32 %v354_v46, %v2237_v20  ;;  %v2510_v12 = vld [vmem:[#allocation21_spill] sm:$0xff] }
 0x206   :  { %1490 = vmatpush3.bf16.msra.mxu0 %v1925_v58  ;;  %1522 = vmatpush3.bf16.msra.mxu1 %v1934_v61  ;;  %v338_v58 = vrot.slane %v337_v53, 2  ;;  %v356_v61 = vrot.slane %v355_v57, 2 }
 0x207   :  { %1492 = vmatprep.subr.bf16.mxu0 %v1948_v2  ;;  %1524 = vmatprep.subr.bf16.mxu1 %v1959_v6 }
 0x208   :  { %v339_v2 = vadd.f32 %v338_v58, %v337_v53  ;;  %v357_v6 = vadd.f32 %v356_v61, %v355_v57 }
 0x20a   :  { %1494 = vmatpush3.bf16.msra.mxu0 %v1961_v7  ;;  %1526 = vmatpush3.bf16.msra.mxu1 %v1970_v10  ;;  %v340_v7 = vrot.slane %v339_v2, 1  ;;  %v358_v10 = vrot.slane %v357_v6, 1 }
 0x20b   :  { %1496 = vmatprep.subr.bf16.mxu0 %v1984_v14  ;;  %1528 = vmatprep.subr.bf16.mxu1 %v1995_v18  ;;  %v2506_v14 = vld [vmem:[#allocation8_spill] sm:$0xff] }
 0x20c   :  { %v341_v18 = vadd.f32 %v340_v7, %v339_v2 }
 0x20e   :  { %1498 = vmatpush3.bf16.msra.mxu0 %v1997_v19  ;;  %1530 = vmatpush3.bf16.msra.mxu1 %v2006_v22  ;;  %v359_v19 = vadd.f32 %v358_v10, %v357_v6  ;;  %v1032_v22 = vlaneseq }
 0x20f   :  { %1500 = vmatprep.subr.bf16.mxu0 %v2020_v26  ;;  %1532 = vmatprep.subr.bf16.mxu1 %v2031_v30 }
 0x210   :  { %v2321_v26 = vshrl.u32 %v1032_v22, 7 }
 0x212   :  { %1502 = vmatpush3.bf16.msra.mxu0 %v2033_v31  ;;  %1534 = vmatpush3.bf16.msra.mxu1 %v2042_v34  ;;  %v2324_v30 = vsub.s32 0, %v2321_v26 }
 0x213   :  { %1504 = vmatprep.subr.bf16.mxu0 %v2056_v40  ;;  %1536 = vmatprep.subr.bf16.mxu1 %v2067_v44 }
 0x216   :  { %1506 = vmatpush3.bf16.msra.mxu0 %v2069_v47  ;;  %1538 = vmatpush3.bf16.msra.mxu1 %v2078_v50 }
 0x217   :  { %1508 = vmatprep.subr.bf16.mxu0 %v2092_v55  ;;  %1540 = vmatprep.subr.bf16.mxu1 %v2103_v62 }
 0x21a   :  { %1510 = vmatpush3.bf16.msra.mxu0 %v2105_v63  ;;  %1542 = vmatpush3.bf16.msra.mxu1 %v2114_v4  ;;  %v2507_v63 = vld [vmem:[#allocation9_spill] sm:$0xff] }
 0x21b   :  { %1512 = vmatprep.subr.bf16.mxu0 %v2128_v11  ;;  %1544 = vmatprep.subr.bf16.mxu1 %v2139_v16  ;;  %v2508_v11 = vld [vmem:[#allocation13_spill] sm:$0xff] }
 0x21e   :  { %1514 = vmatpush3.bf16.msra.mxu0 %v2141_v17  ;;  %1546 = vmatpush3.bf16.msra.mxu1 %v2506_v14  ;;  %v2509_v17 = vld [vmem:[#allocation17_spill] sm:$0xff] }
 0x21f   :  { %1548 = vmatprep.subr.bf16.mxu0 %v2250_v23  ;;  %1552 = vmatprep.subr.bf16.mxu1 %v2261_v52  ;;  %v2513_v23 = vld [vmem:[#allocation18_spill] sm:$0xff]  ;;  %v2515_v52 = vld [vmem:[#allocation11_spill] sm:$0xff] }
 0x221   :  { %792 = vmatmul.mubr.f32.vlgmr.msra.gmra.mrb[12].mxu0 %v341_v18  ;;  %862 = vmatmul.mubr.f32.vlgmr.msra.gmra.mrb[12].mxu1 %v359_v19 }
 0x222   :  { %1550 = vmatpush1.bf16.msra.mxu0 %v2263_v5  ;;  %1554 = vmatpush1.bf16.msra.mxu1 %v2272_v43  ;;  %v2517_v43 = vld [vmem:[#allocation19_spill] sm:$0xff] }
 0x223   :  { %934 = vmatprep.mubr.f32.mxu0 %v2505_v35  ;;  %1005 = vmatprep.mubr.f32.mxu1 %v2505_v35  ;;  %v2511_v35 = vld [vmem:[#allocation10_spill] sm:$0xff] }
 0x2d4   :  { %v651_v31 = vpop.f32.mrb[10].mxu0  ;;  %v722_v34 = vpop.f32.mrb[10].mxu1 }
 0x2d5   :  { %v2327_v40 = vrot.slane %v651_v31, %v2324_v30  ;;  %v2330_v44 = vrot.slane %v722_v34, %v2324_v30  ;;  %v653_v47 = vpop.f32.mrb[11].mxu0  ;;  %v724_v50 = vpop.f32.mrb[11].mxu1  ;;  %v1012_v27 = vmul.f32 %v651_v31, %v651_v31  ;;  %v1014_v45 = vmul.f32 %v722_v34, %v722_v34  ;;  %v1064_v31 = vld [vmem:[%s2451_s4] ss:$2 sm:$0xf] }
 0x2d6   :  { %v2333_v55 = vrot.slane %v653_v47, %v2324_v30  ;;  %v2336_v62 = vrot.slane %v724_v50, %v2324_v30  ;;  %v1013_v46 = vmul.f32 %v653_v47, %v653_v47  ;;  %v1015_v53 = vmul.f32 %v724_v50, %v724_v50 }
 0x2d7   :  { %v1048_v4 = vsub.f32 %v2507_v63, %v2327_v40  ;;  %v1052_v16 = vsub.f32 %v2508_v11, %v2327_v40  ;;  %v1056_v15 = vsub.f32 %v2509_v17, %v2327_v40  ;;  %v1060_v20 = vsub.f32 %v2510_v12, %v2327_v40 }
 0x2d8   :  { %v1050_v25 = vsub.f32 %v2511_v35, %v2330_v44  ;;  %v1054_v24 = vsub.f32 %v2512_v28, %v2330_v44  ;;  %v1058_v32 = vsub.f32 %v2513_v23, %v2330_v44  ;;  %v1062_v42 = vsub.f32 %v2514_v41, %v2330_v44 }
 0x2d9   :  { %v1049_v5 = vsub.f32 %v2515_v52, %v2333_v55  ;;  %v1053_v60 = vsub.f32 %v2516_v13, %v2333_v55  ;;  %v1057_v56 = vsub.f32 %v2517_v43, %v2333_v55  ;;  %v1061_v8 = vsub.f32 %v2518_v1, %v2333_v55 }
 0x2da   :  { %v1051_v21 = vsub.f32 %v2519_v9, %v2336_v62  ;;  %v1055_v48 = vsub.f32 %v2520_v33, %v2336_v62  ;;  %v1059_v36 = vsub.f32 %v2521_v29, %v2336_v62  ;;  %v1063_v37 = vsub.f32 %v2522_v49, %v2336_v62 }
 0x2db   :  { %v1076_v34 = vsub.s32 2, %v2321_v26  ;;  %v1072_v47 = vsub.s32 1, %v2321_v26  ;;  %v1080_v50 = vsub.s32 3, %v2321_v26 }
 0x2f4   :  { %v1309_v51 = vpop.f32.mrb[12].mxu0  ;;  %v1344_v59 = vpop.f32.mrb[12].mxu1 }
 0x2f5   :  { %v1310_v54 = vpop.f32.mrb[13].mxu0  ;;  %v1345_v0 = vpop.f32.mrb[13].mxu1 }
 0x2f6   :  { %v1311_v3 = vadd.f32 %v1310_v54, %v1309_v51  ;;  %v1346_v38 = vadd.f32 %v1345_v0, %v1344_v59 }
 0x2f8   :  { %v864_v39 = vadd.f32 %v1346_v38, %v1311_v3  ;;  %v1069_v38 = vrot.slane %v1064_v31, %v2324_v30 }
 0x2fa   :  { %1204 = vmatmul.mubr.msk.f32.vlgmr.msra.gmra.mrb[14].mxu0 %vm581_vm0, %v864_v39  ;;  %1205 = vmatmul.mubr.msk.f32.vlgmr.msra.gmra.mrb[14].mxu1 %vm581_vm0, %v864_v39  ;;  %v1077_v39 = vrot.slane %v1064_v31, %v1076_v34 }
 0x3cd   :  { %v936_v57 = vpop.f32.mrb[14].mxu0  ;;  %v1007_v58 = vpop.f32.mrb[14].mxu1 }
 0x3ce   :  { %v1016_v61 = vsub.f32 %v936_v57, %v1012_v27  ;;  %v1018_v2 = vsub.f32 %v1007_v58, %v1014_v45  ;;  %v938_v6 = vpop.f32.mrb[15].mxu0  ;;  %v1009_v7 = vpop.f32.mrb[15].mxu1  ;;  %v1206_v45 = vld [vmem:[%s2451_s4 + $0x1] ss:$2 sm:$0xf]  ;;  %s1622_s4 = smov [#allocation5]  }
 0x3cf   :  { %v1017_v10 = vsub.f32 %v938_v6, %v1013_v46  ;;  %v1019_v14 = vsub.f32 %v1009_v7, %v1015_v53  ;;  %v1073_v46 = vrot.slane %v1064_v31, %v1072_v47  ;;  %v1081_v53 = vrot.slane %v1064_v31, %v1080_v50  ;;  %s1190_s14 = sshll.u32 %s1622_s4, 4  ;;  %s1191_s14 = int_to_ptr.vmem [resolvable:$true] %s1190_s14 }
 0x3d0   :  { %v1020_v18 = vmax.f32 %v1016_v61, 0.0  ;;  %v1022_v19 = vmax.f32 %v1018_v2, 0.0  ;;  %v1132_v28 = vrot.slane %v1206_v45, %v1072_v47  ;;  %v1140_v31 = vrot.slane %v1206_v45, %v1080_v50  ;;  %s1592_s15 = scalar_lea.vmem %s1191_s14, 1024  ;;  %p1597_p9 = scmp.lt.s32.totalorder %s1191_s14, %s1191_s14 }
 0x3d1   :  { %v1021_v22 = vmax.f32 %v1017_v10, 0.0  ;;  %v1023_v51 = vmax.f32 %v1019_v14, 0.0  ;;  %v1128_v10 = vrot.slane %v1206_v45, %v2324_v30  ;;  %v1136_v14 = vrot.slane %v1206_v45, %v1076_v34  ;;  %p1593_p8 = scmp.ne.s32.totalorder %s1191_s14, %s1592_s15  ;;  %p1598_p10 = scmp.lt.s32.totalorder %s1592_s15, %s1592_s15 }
 0x3d2   :  { %v1024_v59 = vadd.f32 1e-05, %v1020_v18  ;;  %v1026_v54 = vadd.f32 1e-05, %v1022_v19 }
 0x3d3   :  { %v1025_v0 = vadd.f32 1e-05, %v1021_v22  ;;  %v1027_v3 = vadd.f32 1e-05, %v1023_v51  ;;  %p1599_p11 = por %p1598_p10, %p1597_p9 }
 0x3d4   :  { %1562 = vrsqrt.f32 %v1024_v59 }
 0x3d5   :  { %1564 = vrsqrt.f32 %v1026_v54  ;;  %p1600_p12 = pnand %p1599_p11, %p1593_p8 }
 0x3d6   :  { %1566 = vrsqrt.f32 %v1025_v0 }
 0x3d7   :  { %1568 = vrsqrt.f32 %v1027_v3 }
 0x3de   :  { %v1563_v27 = vpop.eup %1562 }
 0x3df   :  { %v1565_v57 = vpop.eup %1564  ;;  %v1086_v58 = vmul.f32 %v1563_v27, %v1069_v38 }
 0x3e0   :  { %v1567_v61 = vpop.eup %1566  ;;  %v1088_v2 = vmul.f32 %v1565_v57, %v1077_v39 }
 0x3e1   :  { %v1569_v6 = vpop.eup %1568  ;;  %v1093_v7 = vrot.slane %v1086_v58, %v2324_v30  ;;  %v1087_v18 = vmul.f32 %v1567_v61, %v1073_v46 }
 0x3e2   :  { %v1101_v26 = vrot.slane %v1088_v2, %v2324_v30  ;;  %v1089_v19 = vmul.f32 %v1569_v6, %v1081_v53 }
 0x3e3   :  { %v1106_v22 = vmul.f32 %v1093_v7, %v1048_v4  ;;  %v1110_v51 = vmul.f32 %v1093_v7, %v1052_v16  ;;  %v1114_v59 = vmul.f32 %v1093_v7, %v1056_v15  ;;  %v1118_v54 = vmul.f32 %v1093_v7, %v1060_v20 }
 0x3e4   :  { %v1108_v0 = vmul.f32 %v1101_v26, %v1050_v25  ;;  %v1112_v63 = vmul.f32 %v1101_v26, %v1054_v24  ;;  %v1116_v4 = vmul.f32 %v1101_v26, %v1058_v32  ;;  %v1120_v11 = vmul.f32 %v1101_v26, %v1062_v42 }
 0x3e5   :  { %v1145_v16 = vadd.f32 %v1128_v10, %v1106_v22  ;;  %v1149_v17 = vadd.f32 %v1128_v10, %v1110_v51  ;;  %v1153_v40 = vadd.f32 %v1128_v10, %v1114_v59  ;;  %v1157_v15 = vadd.f32 %v1128_v10, %v1118_v54 }
 0x3e6   :  { %v1147_v12 = vadd.f32 %v1136_v14, %v1108_v0  ;;  %v1151_v20 = vadd.f32 %v1136_v14, %v1112_v63  ;;  %v1155_v35 = vadd.f32 %v1136_v14, %v1116_v4  ;;  %v1159_v25 = vadd.f32 %v1136_v14, %v1120_v11 }
 0x3e7   :  { %v1097_v3 = vrot.slane %v1087_v18, %v2324_v30  ;;  %v1105_v24 = vrot.slane %v1089_v19, %v2324_v30 }
 0x3e8   :  { %v1161_v23 = vadd.f32 %v1147_v12, %v1145_v16  ;;  %v1163_v32 = vadd.f32 %v1151_v20, %v1149_v17  ;;  %v1165_v34 = vadd.f32 %v1155_v35, %v1153_v40  ;;  %v1167_v38 = vadd.f32 %v1159_v25, %v1157_v15 }
 0x3e9   :  { %v1107_v44 = vmul.f32 %v1097_v3, %v1049_v5  ;;  %v1111_v41 = vmul.f32 %v1097_v3, %v1053_v60  ;;  %v1115_v42 = vmul.f32 %v1097_v3, %v1057_v56  ;;  %v1119_v30 = vmul.f32 %v1097_v3, %v1061_v8 }
 0x3ea   :  { %v1169_v47 = vmax.f32 %v1161_v23, 0.0  ;;  %v1171_v50 = vmax.f32 %v1163_v32, 0.0  ;;  %v1173_v39 = vmax.f32 %v1165_v34, 0.0  ;;  %v1175_v27 = vmax.f32 %v1167_v38, 0.0 }
 0x3eb   :  { %v1146_v45 = vadd.f32 %v1132_v28, %v1107_v44  ;;  %v1150_v46 = vadd.f32 %v1132_v28, %v1111_v41  ;;  %v1154_v52 = vadd.f32 %v1132_v28, %v1115_v42  ;;  %v1158_v5 = vadd.f32 %v1132_v28, %v1119_v30 }
 0x3ec   :  { %1177 = vst [vmem:[#allocation5] sm:$0xff] %v1169_v47  ;;  %1179 = vst [vmem:[#allocation5 + $0x10] sm:$0xff] %v1171_v50  ;;  %v1109_v13 = vmul.f32 %v1105_v24, %v1051_v21  ;;  %v1113_v55 = vmul.f32 %v1105_v24, %v1055_v48  ;;  %v1117_v60 = vmul.f32 %v1105_v24, %v1059_v36 }
 0x3ed   :  { %1181 = vst [vmem:[#allocation5 + $0x20] sm:$0xff] %v1173_v39  ;;  %1183 = vst [vmem:[#allocation5 + $0x30] sm:$0xff] %v1175_v27  ;;  %v1121_v43 = vmul.f32 %v1105_v24, %v1063_v37 }
 0x3ee   :  { %v1148_v56 = vadd.f32 %v1140_v31, %v1109_v13  ;;  %v1152_v1 = vadd.f32 %v1140_v31, %v1113_v55  ;;  %v1156_v8 = vadd.f32 %v1140_v31, %v1117_v60 }
 0x3ef   :  { %v1160_v53 = vadd.f32 %v1140_v31, %v1121_v43 }
 0x3f0   :  { %v1162_v9 = vadd.f32 %v1148_v56, %v1146_v45  ;;  %v1164_v21 = vadd.f32 %v1152_v1, %v1150_v46  ;;  %v1166_v57 = vadd.f32 %v1156_v8, %v1154_v52 }
 0x3f1   :  { %v1168_v58 = vadd.f32 %v1160_v53, %v1158_v5 }
 0x3f2   :  { %v1170_v33 = vmax.f32 %v1162_v9, 0.0  ;;  %v1172_v48 = vmax.f32 %v1164_v21, 0.0  ;;  %v1174_v61 = vmax.f32 %v1166_v57, 0.0 }
 0x3f3   :  { %v1176_v29 = vmax.f32 %v1168_v58, 0.0 }
 0x3f4   :  { %1178 = vst [vmem:[#allocation5 + $0x8] sm:$0xff] %v1170_v33  ;;  %1180 = vst [vmem:[#allocation5 + $0x18] sm:$0xff] %v1172_v48 }
 0x3f5   :  { %1182 = vst [vmem:[#allocation5 + $0x28] sm:$0xff] %v1174_v61  ;;  %1184 = vst [vmem:[#allocation5 + $0x38] sm:$0xff] %v1176_v29 }
 0x3f6   :  { %1603 = shalt.err (!%p1600_p12)
}
 0x3f7   :  { %s1604_s18 = scalar_lea.hbm %s2452_s5, 1024 }
 0x3f8   :  { %p1605_p13 = scmp.ne.s32.totalorder %s2452_s5, %s1604_s18  ;;  %p1608_p0 = scmp.lt.u32.totalorder %s1604_s18, %s2452_s5 }
 0x3fa   :  { %p1610_p1 = pnand %p1608_p0, %p1605_p13 }
 0x3fc   :  { %1613 = shalt.err (!%p1610_p1)
}
 0x3fd   :  { %s1623_s2 = smov 256   ;;  %s1624_s23 = smov 16  }
 0x3fe   :  { %1196 = dma.vmem_to_hbm [thread:$0]  %s1191_s14, 1024, %s2452_s5, [#allocation4], %s1623_s2, %s1623_s2, %s1624_s23  }
 0x3ff   :  { %1616 = dma.done.wait [#allocation4], 1024  }
 0x400   :  { %1617 = vsyncadd [#allocation4], 4294966272 }
 0x401   :  { %1200 = vsyncpa [#allocation3], 1 }
 0x402   :  { %1201 = vsyncpa [#allocation4], 1 }

</bundles_post_ra>
